<compile_context>
chip_gen: v7x
topology: tpu7x:2x2x1
jax: 0.10.0
libtpu: 0.0.40
codegen_flags: <defaults>
</compile_context>

<pallas_src>
import functools
import math

import jax
import jax.numpy as jnp
from jax.experimental import pallas as pl
from jax.experimental.pallas import tpu as pltpu


# --------------------------------------------------------------------------
# Generation-aware VMEM budget (v7x has only 64 MiB physical VMEM).
# --------------------------------------------------------------------------

@functools.lru_cache(maxsize=None)
def _vmem_limit_bytes():
    cap = 64 * 1024 * 1024                       # conservative default (= v7x physical)
    try:
        cap = int(getattr(pltpu.get_tpu_info(), "vmem_capacity_bytes", cap))
    except Exception:
        pass
    return max(int(cap * 0.7), 32 * 1024 * 1024)


def _mosaic_params(*semantics):
    return pltpu.CompilerParams(dimension_semantics=tuple(semantics),
                                vmem_limit_bytes=_vmem_limit_bytes())


# --------------------------------------------------------------------------
# Fused Q/K/V/P projections: one launch, bf16 MXU operands, f32 accumulation.
# Only the query projection has a bias (matches the PyTorch module).
# --------------------------------------------------------------------------

def _qkvp_proj_kernel(xq_ref, xk_ref, xv_ref, xp_ref,
                      wq_ref, wk_ref, wv_ref, wp_ref, bq_ref,
                      q_ref, k_ref, v_ref, p_ref):
    def mm(x_ref, w_ref):
        return jnp.dot(x_ref[...].astype(jnp.bfloat16),
                       w_ref[...].astype(jnp.bfloat16),
                       preferred_element_type=jnp.float32)

    q_ref[...] = mm(xq_ref, wq_ref) + bq_ref[...]
    k_ref[...] = mm(xk_ref, wk_ref)
    v_ref[...] = mm(xv_ref, wv_ref)
    p_ref[...] = mm(xp_ref, wp_ref)


def pallas_qkvp_projections(xq, xk, xv, xp, wq_t, wk_t, wv_t, wp_t, bq,
                            *, block_rows=512):
    n, din = xq.shape
    dout = wq_t.shape[1]
    tm = block_rows if n >= block_rows else n      # tm mult-of-8 or == full dim
    row_spec = pl.BlockSpec((tm, din), lambda i: (i, 0))
    w_spec = pl.BlockSpec((din, dout), lambda i: (0, 0))
    b_spec = pl.BlockSpec((1, dout), lambda i: (0, 0))
    out_spec = pl.BlockSpec((tm, dout), lambda i: (i, 0))
    osd = jax.ShapeDtypeStruct((n, dout), jnp.float32)
    return pl.pallas_call(
        _qkvp_proj_kernel,
        out_shape=(osd, osd, osd, osd),
        grid=(pl.cdiv(n, tm),),                    # ragged tail handled, no jnp.pad
        in_specs=[row_spec, row_spec, row_spec, row_spec,
                  w_spec, w_spec, w_spec, w_spec, b_spec],
        out_specs=(out_spec, out_spec, out_spec, out_spec),
        compiler_params=_mosaic_params("parallel"),
    )(xq, xk, xv, xp, wq_t, wk_t, wv_t, wp_t, bq)


# --------------------------------------------------------------------------
# Row-tiled linear with bias (used for the output projection only).
# --------------------------------------------------------------------------

def _linear_kernel(x_ref, w_ref, b_ref, o_ref):
    o_ref[...] = jnp.dot(x_ref[...].astype(jnp.bfloat16),
                         w_ref[...].astype(jnp.bfloat16),
                         preferred_element_type=jnp.float32) + b_ref[...]


def pallas_linear(x, w_t, b, *, block_rows=512):
    n, din = x.shape
    dout = w_t.shape[1]
    tm = block_rows if n >= block_rows else n
    return pl.pallas_call(
        _linear_kernel,
        out_shape=jax.ShapeDtypeStruct((n, dout), jnp.float32),
        grid=(pl.cdiv(n, tm),),
        in_specs=[pl.BlockSpec((tm, din), lambda i: (i, 0)),
                  pl.BlockSpec((din, dout), lambda i: (0, 0)),
                  pl.BlockSpec((1, dout), lambda i: (0, 0))],
        out_specs=pl.BlockSpec((tm, dout), lambda i: (i, 0)),
        compiler_params=_mosaic_params("parallel"),
    )(x, w_t, b)


# --------------------------------------------------------------------------
# Relative shift helpers
# --------------------------------------------------------------------------

@functools.lru_cache(maxsize=None)
def _xlu_roll_matches_jnp():
    """One-time probe: does pltpu.roll (XLU rotate) match jnp.roll semantics?

    The 128-lane-aligned production path uses pltpu.roll; if the probe cannot
    confirm jnp.roll-compatible shift direction on this jax/libtpu build we
    fall back to the slice+concat path (always correct).
    """
    try:
        def kern(x_ref, o_ref):
            o_ref[...] = pltpu.roll(x_ref[...], 1, 1)

        x = jnp.broadcast_to(jnp.arange(128, dtype=jnp.float32), (8, 128))
        y = pl.pallas_call(
            kern, out_shape=jax.ShapeDtypeStruct((8, 128), jnp.float32))(x)
        return bool(jnp.array_equal(y, jnp.roll(x, 1, axis=1)))
    except Exception:
        return False


def _roll_lanes(x, amt, use_xlu_roll):
    amt = amt % x.shape[-1]
    if amt == 0:
        return x
    if use_xlu_roll and x.shape[-1] % 128 == 0:
        return pltpu.roll(x, amt, x.ndim - 1)      # XLU rotate (free-ish slot)
    return jnp.roll(x, amt, axis=-1)               # slice+concat fallback


def _relative_shift(pos_score, take_bits, in_lower, on_superdiag, use_xlu_roll):
    """Vectorized Transformer-XL relative shift of a square (T, T) score.

    Closed form of torch's pad-zero-column / reshape / drop-row trick:
        shifted[i, j] = pos_score[i, T-1+j-i]   for j <= i
                      = 0                       for j == i+1
                      = pos_score[i+1, j-i-2]   for j >= i+2
    Barrel shifter: O(log T) static rolls selected by the precomputed per-bit
    row masks (take_bits), then one row roll and two selects.
    """
    a_roll = _roll_lanes(pos_score, 1, use_xlu_roll)
    for bit, take in enumerate(take_bits):
        a_roll = jnp.where(take, _roll_lanes(a_roll, 1 << bit, use_xlu_roll),
                           a_roll)
    # b_roll[i, j] = a_roll[i+1, j] = pos_score[i+1, (j - i - 2) mod T]
    b_roll = jnp.roll(a_roll, -1, axis=0)
    zero = jnp.float32(0.0)
    return jnp.where(in_lower, a_roll, jnp.where(on_superdiag, zero, b_roll))


# --------------------------------------------------------------------------
# Relative multi-head attention kernel (one batch element per grid program)
# --------------------------------------------------------------------------

def _rel_attn_kernel(q_ref, k_ref, v_ref, p_ref, ub_ref, vb_ref, m_ref,
                     ctx_ref, attn_ref, *, num_heads, d_head, inv_sqrt_dim,
                     use_xlu_roll):
    t = q_ref.shape[0]

    # ---- Head-invariant precompute (hoisted out of the head loop) ----------
    mask_bool = m_ref[...] != 0                            # (1,T) or (T,T)
    row_ids = jax.lax.broadcasted_iota(jnp.int32, (t, t), 0)
    col_ids = jax.lax.broadcasted_iota(jnp.int32, (t, t), 1)
    nbits = max(1, (t - 1).bit_length())
    take_bits = [((row_ids >> b) & 1) == 1 for b in range(nbits)]
    in_lower = col_ids <= row_ids
    on_superdiag = col_ids == row_ids + 1
    neg = jnp.float32(-1000000000.0)

    # bf16 MXU operands (f32 accumulation); cast whole tiles once, slice later.
    q_f32 = q_ref[...]
    k_bf = k_ref[...].astype(jnp.bfloat16)
    v_bf = v_ref[...].astype(jnp.bfloat16)
    p_bf = p_ref[...].astype(jnp.bfloat16)
    u_all = ub_ref[...]
    vb_all = vb_ref[...]

    contract_last = (((1,), (1,)), ((), ()))
    ctx_parts = []

    # Static unroll over heads: slices are static lane ranges of the (T, D)
    # tiles, so no HBM head transposes are ever needed.
    for h in range(num_heads):
        lo = h * d_head
        hi = lo + d_head
        q = q_f32[:, lo:hi]
        kb = k_bf[:, lo:hi]
        vb16 = v_bf[:, lo:hi]
        pb = p_bf[:, lo:hi]
        u = u_all[h:h + 1, :]
        vbias = vb_all[h:h + 1, :]

        # Fold 1/sqrt(d_model) into the query side (O(T*dh) instead of O(T*T)).
        qc = ((q + u) * inv_sqrt_dim).astype(jnp.bfloat16)
        qp = ((q + vbias) * inv_sqrt_dim).astype(jnp.bfloat16)

        content = jax.lax.dot_general(qc, kb, contract_last,
                                      preferred_element_type=jnp.float32)
        pos_score = jax.lax.dot_general(qp, pb, contract_last,
                                        preferred_element_type=jnp.float32)

        score = content + _relative_shift(pos_score, take_bits, in_lower,
                                          on_superdiag, use_xlu_roll)
        score = jnp.where(mask_bool, neg, score)           # broadcast (1,T)->(T,T)

        # Softmax over keys; reciprocal on the EUP slot.
        score = score - jnp.max(score, axis=-1, keepdims=True)
        e = jnp.exp(score)
        denom = jnp.sum(e, axis=-1, keepdims=True)
        attn = e * pl.reciprocal(denom, approx=True)

        attn_ref[h, :, :] = attn
        ctx_parts.append(jnp.dot(attn.astype(jnp.bfloat16), vb16,
                                 preferred_element_type=jnp.float32))

    # Single lane-dense (T, D) store instead of H masked partial-lane stores.
    ctx_ref[...] = jnp.concatenate(ctx_parts, axis=-1)


def pallas_relative_attention(q, k, v, p, u_bias, v_bias, mask_i,
                              d_model, num_heads):
    b, t, d = q.shape
    dh = d // num_heads
    mrows = mask_i.shape[1]

    kern = functools.partial(
        _rel_attn_kernel, num_heads=num_heads, d_head=dh,
        inv_sqrt_dim=1.0 / math.sqrt(d_model),
        use_xlu_roll=_xlu_roll_matches_jnp())

    btd_spec = pl.BlockSpec((None, t, d), lambda bi: (bi, 0, 0))
    bias_spec = pl.BlockSpec((num_heads, dh), lambda bi: (0, 0))

    ctx, attn = pl.pallas_call(
        kern,
        out_shape=(
            jax.ShapeDtypeStruct((b, t, d), jnp.float32),
            jax.ShapeDtypeStruct((b, num_heads, t, t), jnp.float32),
        ),
        grid=(b,),
        in_specs=[
            btd_spec,   # q
            btd_spec,   # k
            btd_spec,   # v
            btd_spec,   # pos
            bias_spec,  # u_bias
            bias_spec,  # v_bias
            pl.BlockSpec((None, mrows, t), lambda bi: (bi, 0, 0)),  # mask
        ],
        out_specs=(
            btd_spec,
            pl.BlockSpec((None, num_heads, t, t), lambda bi: (bi, 0, 0, 0)),
        ),
        compiler_params=_mosaic_params("parallel"),
    )(q, k, v, p, u_bias, v_bias, mask_i)
    return ctx, attn


# --------------------------------------------------------------------------
# Module-level forward (glue reshapes only; no HBM transposes anywhere)
# --------------------------------------------------------------------------

def relative_multi_head_attention(query, key, value, pos_embedding, mask,
                                  params, num_heads):
    b, t, d = query.shape

    q, k, v, p = pallas_qkvp_projections(
        query.reshape(b * t, d), key.reshape(b * t, d),
        value.reshape(b * t, d), pos_embedding.reshape(b * t, d),
        params["wq_t"], params["wk_t"], params["wv_t"], params["wp_t"],
        params["bq"])

    q = q.reshape(b, t, d)
    k = k.reshape(b, t, d)
    v = v.reshape(b, t, d)
    p = p.reshape(b, t, d)

    mask_i = mask.astype(jnp.int32)
    if mask_i.ndim == 2:                    # (B, T) -> (B, 1, T)
        mask_i = mask_i[:, None, :]

    ctx, attn = pallas_relative_attention(
        q, k, v, p, params["u_bias"], params["v_bias"], mask_i, d, num_heads)

    out = pallas_linear(ctx.reshape(b * t, d), params["wo_t"], params["bo"])
    return out.reshape(b, t, d), attn


# --------------------------------------------------------------------------
# Pure-JAX reference (mirrors the PyTorch forward, f32 HIGHEST) for checking
# --------------------------------------------------------------------------

def reference_forward(query, key, value, pos_embedding, mask, params, num_heads):
    hp = jax.lax.Precision.HIGHEST
    b, t, d = query.shape
    dh = d // num_heads

    def lin(x, wt, bias=None):
        y = jnp.matmul(x, wt, precision=hp)
        return y + bias if bias is not None else y

    q = lin(query, params["wq_t"], params["bq"]).reshape(b, t, num_heads, dh)
    k = lin(key, params["wk_t"]).reshape(b, t, num_heads, dh).transpose(0, 2, 1, 3)
    v = lin(value, params["wv_t"]).reshape(b, t, num_heads, dh).transpose(0, 2, 1, 3)
    p = lin(pos_embedding, params["wp_t"]).reshape(b, t, num_heads, dh)

    u = params["u_bias"][None, None]   # (1,1,H,dh)
    vb = params["v_bias"][None, None]

    a = (q + u).transpose(0, 2, 1, 3)                        # (B,H,T,dh)
    content = jnp.einsum("bhtd,bhsd->bhts", a, k, precision=hp)
    bq = (q + vb).transpose(0, 2, 1, 3)
    pos_score = jnp.einsum("bhtd,bshd->bhts", bq, p, precision=hp)

    # relative shift exactly as the torch module does it
    bb, hh, t1, t2 = pos_score.shape
    padded = jnp.concatenate(
        [jnp.zeros((bb, hh, t1, 1), pos_score.dtype), pos_score], axis=-1)
    padded = padded.reshape(bb, hh, t2 + 1, t1)
    pos_score = padded[:, :, 1:].reshape(bb, hh, t1, t2)

    score = (content + pos_score) * (1.0 / math.sqrt(d))
    mask_b = jnp.broadcast_to(mask, (b, t, t))[:, None]      # (B,1,T,T)
    score = jnp.where(mask_b, -1000000000.0, score)
    attn = jax.nn.softmax(score, axis=-1)
    ctx = jnp.einsum("bhts,bhsd->bhtd", attn, v, precision=hp)
    ctx = ctx.transpose(0, 2, 1, 3).reshape(b, t, d)
    out = lin(ctx, params["wo_t"], params["bo"])
    return out, attn


# --------------------------------------------------------------------------
# Deterministic parameter init
# --------------------------------------------------------------------------

def init_params(rng, d_model, num_heads):
    dh = d_model // num_heads
    ks = jax.random.split(rng, 9)
    s = 1.0 / math.sqrt(d_model)

    def uni(k, shape):
        return jax.random.uniform(k, shape, jnp.float32, minval=-s, maxval=s)

    return {
        "wq_t": uni(ks[0], (d_model, d_model)),
        "bq": uni(ks[1], (1, d_model)),
        "wk_t": uni(ks[2], (d_model, d_model)),
        "wv_t": uni(ks[3], (d_model, d_model)),
        "wp_t": uni(ks[4], (d_model, d_model)),
        "wo_t": uni(ks[5], (d_model, d_model)),
        "bo": uni(ks[6], (1, d_model)),
        "u_bias": uni(ks[7], (num_heads, dh)),
        "v_bias": uni(ks[8], (num_heads, dh)),
    }


def _run_case(batch, seq, d_model, heads, seed, masked_tail):
    root = jax.random.PRNGKey(seed)
    kq, kk, kv, kp, kparam = jax.random.split(root, 5)
    query = jax.random.normal(kq, (batch, seq, d_model), jnp.float32)
    key_in = jax.random.normal(kk, (batch, seq, d_model), jnp.float32)
    value = jax.random.normal(kv, (batch, seq, d_model), jnp.float32)
    pos_emb = jax.random.normal(kp, (batch, seq, d_model), jnp.float32)

    # padding mask: batch 0 fully valid, others mask their last few keys
    lengths = jnp.array([seq] + [seq - masked_tail] * (batch - 1))
    mask = jnp.arange(seq)[None, None, :] >= lengths[:, None, None]  # (B,1,T)

    params = init_params(kparam, d_model, heads)

    out, attn = relative_multi_head_attention(query, key_in, value, pos_emb,
                                              mask, params, heads)
    out = jax.block_until_ready(out)
    attn = jax.block_until_ready(attn)

    ref_out, ref_attn = reference_forward(query, key_in, value, pos_emb,
                                          mask, params, heads)

    assert out.shape == (batch, seq, d_model)
    assert attn.shape == (batch, heads, seq, seq)
    # bf16-MXU / approx-reciprocal tolerance vs the f32 HIGHEST reference.
    assert jnp.allclose(attn, ref_attn, atol=2e-2, rtol=2e-2), "attn mismatch"
    assert jnp.allclose(out, ref_out, atol=2e-2, rtol=2e-2), "output mismatch"


if __name__ == "__main__":
    # Small case (exercises the slice+concat roll fallback and tiny tiles).
    _run_case(batch=2, seq=8, d_model=32, heads=4, seed=0, masked_tail=2)
    # 128-lane-aligned case (exercises the pltpu.roll XLU path and dh=64 slices).
    _run_case(batch=2, seq=128, d_model=256, heads=4, seed=1, masked_tail=16)
    print("KERNEL_OK")
</pallas_src>

<mosaic_0001>
module attributes {stable_mosaic.version = 11 : i64} {
  func.func @_qkvp_proj_kernel(%arg0: i32, %arg1: memref<16x32xf32, #tpu.memory_space<vmem>>, %arg2: memref<16x32xf32, #tpu.memory_space<vmem>>, %arg3: memref<16x32xf32, #tpu.memory_space<vmem>>, %arg4: memref<16x32xf32, #tpu.memory_space<vmem>>, %arg5: memref<32x32xf32, #tpu.memory_space<vmem>>, %arg6: memref<32x32xf32, #tpu.memory_space<vmem>>, %arg7: memref<32x32xf32, #tpu.memory_space<vmem>>, %arg8: memref<32x32xf32, #tpu.memory_space<vmem>>, %arg9: memref<1x32xf32, #tpu.memory_space<vmem>>, %arg10: memref<16x32xf32, #tpu.memory_space<vmem>>, %arg11: memref<16x32xf32, #tpu.memory_space<vmem>>, %arg12: memref<16x32xf32, #tpu.memory_space<vmem>>, %arg13: memref<16x32xf32, #tpu.memory_space<vmem>>) attributes {dimension_semantics = [#tpu.dimension_semantics<parallel>], iteration_bounds = array<i64: 1>, scalar_prefetch = 0 : i64, scratch_operands = 0 : i64, tpu.core_type = #tpu.core_type<tc>, window_params = [{transform_indices = @transform_0, window_bounds = array<i64: 16, 32>}, {transform_indices = @transform_1, window_bounds = array<i64: 16, 32>}, {transform_indices = @transform_2, window_bounds = array<i64: 16, 32>}, {transform_indices = @transform_3, window_bounds = array<i64: 16, 32>}, {pipeline_mode = #tpu.pipeline_mode<synchronous>, transform_indices = @transform_4, window_bounds = array<i64: 32, 32>}, {pipeline_mode = #tpu.pipeline_mode<synchronous>, transform_indices = @transform_5, window_bounds = array<i64: 32, 32>}, {pipeline_mode = #tpu.pipeline_mode<synchronous>, transform_indices = @transform_6, window_bounds = array<i64: 32, 32>}, {pipeline_mode = #tpu.pipeline_mode<synchronous>, transform_indices = @transform_7, window_bounds = array<i64: 32, 32>}, {pipeline_mode = #tpu.pipeline_mode<synchronous>, transform_indices = @transform_8, window_bounds = array<i64: 1, 32>}, {transform_indices = @transform_9, window_bounds = array<i64: 16, 32>}, {transform_indices = @transform_10, window_bounds = array<i64: 16, 32>}, {transform_indices = @transform_11, window_bounds = array<i64: 16, 32>}, {transform_indices = @transform_12, window_bounds = array<i64: 16, 32>}]} {
    %c0 = arith.constant 0 : index
    %c0_0 = arith.constant 0 : index
    %0 = vector.load %arg1[%c0, %c0_0] : memref<16x32xf32, #tpu.memory_space<vmem>>, vector<16x32xf32>
    %1 = arith.truncf %0 : vector<16x32xf32> to vector<16x32xbf16>
    %c0_1 = arith.constant 0 : index
    %c0_2 = arith.constant 0 : index
    %2 = vector.load %arg5[%c0_1, %c0_2] : memref<32x32xf32, #tpu.memory_space<vmem>>, vector<32x32xf32>
    %3 = arith.truncf %2 : vector<32x32xf32> to vector<32x32xbf16>
    %cst = arith.constant dense<0.000000e+00> : vector<16x32xf32>
    %4 = tpu.matmul %1, %3, %cst {dimension_numbers = #tpu.dot_dimension_numbers<[1], [0], [0], [1], [0, 0, 1, 1], [], []>} : vector<16x32xbf16>, vector<32x32xbf16>, vector<16x32xf32> -> vector<16x32xf32>
    %c0_3 = arith.constant 0 : index
    %c0_4 = arith.constant 0 : index
    %5 = vector.load %arg9[%c0_3, %c0_4] : memref<1x32xf32, #tpu.memory_space<vmem>>, vector<1x32xf32>
    %6 = vector.broadcast %5 : vector<1x32xf32> to vector<16x32xf32>
    %7 = arith.addf %4, %6 : vector<16x32xf32>
    %c0_5 = arith.constant 0 : index
    %c0_6 = arith.constant 0 : index
    %8 = vector.load %arg10[%c0_5, %c0_6] : memref<16x32xf32, #tpu.memory_space<vmem>>, vector<16x32xf32>
    tpu.vector_store %arg10[%c0_5, %c0_6], %7 {strides = array<i32>} : memref<16x32xf32, #tpu.memory_space<vmem>>, vector<16x32xf32>,
    %c0_7 = arith.constant 0 : index
    %c0_8 = arith.constant 0 : index
    %9 = vector.load %arg2[%c0_7, %c0_8] : memref<16x32xf32, #tpu.memory_space<vmem>>, vector<16x32xf32>
    %10 = arith.truncf %9 : vector<16x32xf32> to vector<16x32xbf16>
    %c0_9 = arith.constant 0 : index
    %c0_10 = arith.constant 0 : index
    %11 = vector.load %arg6[%c0_9, %c0_10] : memref<32x32xf32, #tpu.memory_space<vmem>>, vector<32x32xf32>
    %12 = arith.truncf %11 : vector<32x32xf32> to vector<32x32xbf16>
    %cst_11 = arith.constant dense<0.000000e+00> : vector<16x32xf32>
    %13 = tpu.matmul %10, %12, %cst_11 {dimension_numbers = #tpu.dot_dimension_numbers<[1], [0], [0], [1], [0, 0, 1, 1], [], []>} : vector<16x32xbf16>, vector<32x32xbf16>, vector<16x32xf32> -> vector<16x32xf32>
    %c0_12 = arith.constant 0 : index
    %c0_13 = arith.constant 0 : index
    %14 = vector.load %arg11[%c0_12, %c0_13] : memref<16x32xf32, #tpu.memory_space<vmem>>, vector<16x32xf32>
    tpu.vector_store %arg11[%c0_12, %c0_13], %13 {strides = array<i32>} : memref<16x32xf32, #tpu.memory_space<vmem>>, vector<16x32xf32>,
    %c0_14 = arith.constant 0 : index
    %c0_15 = arith.constant 0 : index
    %15 = vector.load %arg3[%c0_14, %c0_15] : memref<16x32xf32, #tpu.memory_space<vmem>>, vector<16x32xf32>
    %16 = arith.truncf %15 : vector<16x32xf32> to vector<16x32xbf16>
    %c0_16 = arith.constant 0 : index
    %c0_17 = arith.constant 0 : index
    %17 = vector.load %arg7[%c0_16, %c0_17] : memref<32x32xf32, #tpu.memory_space<vmem>>, vector<32x32xf32>
    %18 = arith.truncf %17 : vector<32x32xf32> to vector<32x32xbf16>
    %cst_18 = arith.constant dense<0.000000e+00> : vector<16x32xf32>
    %19 = tpu.matmul %16, %18, %cst_18 {dimension_numbers = #tpu.dot_dimension_numbers<[1], [0], [0], [1], [0, 0, 1, 1], [], []>} : vector<16x32xbf16>, vector<32x32xbf16>, vector<16x32xf32> -> vector<16x32xf32>
    %c0_19 = arith.constant 0 : index
    %c0_20 = arith.constant 0 : index
    %20 = vector.load %arg12[%c0_19, %c0_20] : memref<16x32xf32, #tpu.memory_space<vmem>>, vector<16x32xf32>
    tpu.vector_store %arg12[%c0_19, %c0_20], %19 {strides = array<i32>} : memref<16x32xf32, #tpu.memory_space<vmem>>, vector<16x32xf32>,
    %c0_21 = arith.constant 0 : index
    %c0_22 = arith.constant 0 : index
    %21 = vector.load %arg4[%c0_21, %c0_22] : memref<16x32xf32, #tpu.memory_space<vmem>>, vector<16x32xf32>
    %22 = arith.truncf %21 : vector<16x32xf32> to vector<16x32xbf16>
    %c0_23 = arith.constant 0 : index
    %c0_24 = arith.constant 0 : index
    %23 = vector.load %arg8[%c0_23, %c0_24] : memref<32x32xf32, #tpu.memory_space<vmem>>, vector<32x32xf32>
    %24 = arith.truncf %23 : vector<32x32xf32> to vector<32x32xbf16>
    %cst_25 = arith.constant dense<0.000000e+00> : vector<16x32xf32>
    %25 = tpu.matmul %22, %24, %cst_25 {dimension_numbers = #tpu.dot_dimension_numbers<[1], [0], [0], [1], [0, 0, 1, 1], [], []>} : vector<16x32xbf16>, vector<32x32xbf16>, vector<16x32xf32> -> vector<16x32xf32>
    %c0_26 = arith.constant 0 : index
    %c0_27 = arith.constant 0 : index
    %26 = vector.load %arg13[%c0_26, %c0_27] : memref<16x32xf32, #tpu.memory_space<vmem>>, vector<16x32xf32>
    tpu.vector_store %arg13[%c0_26, %c0_27], %25 {strides = array<i32>} : memref<16x32xf32, #tpu.memory_space<vmem>>, vector<16x32xf32>,
    return
  }
  func.func @transform_0(%arg0: i32) -> (i32, i32) {
    %c0_i32 = arith.constant 0 : i32
    %c0_i32_0 = arith.constant 0 : i32
    return %arg0, %c0_i32 : i32, i32
  }
  func.func @transform_1(%arg0: i32) -> (i32, i32) {
    %c0_i32 = arith.constant 0 : i32
    %c0_i32_0 = arith.constant 0 : i32
    return %arg0, %c0_i32 : i32, i32
  }
  func.func @transform_2(%arg0: i32) -> (i32, i32) {
    %c0_i32 = arith.constant 0 : i32
    %c0_i32_0 = arith.constant 0 : i32
    return %arg0, %c0_i32 : i32, i32
  }
  func.func @transform_3(%arg0: i32) -> (i32, i32) {
    %c0_i32 = arith.constant 0 : i32
    %c0_i32_0 = arith.constant 0 : i32
    return %arg0, %c0_i32 : i32, i32
  }
  func.func @transform_4(%arg0: i32) -> (i32, i32) {
    %c0_i32 = arith.constant 0 : i32
    %c0_i32_0 = arith.constant 0 : i32
    %c0_i32_1 = arith.constant 0 : i32
    return %c0_i32, %c0_i32_0 : i32, i32
  }
  func.func @transform_5(%arg0: i32) -> (i32, i32) {
    %c0_i32 = arith.constant 0 : i32
    %c0_i32_0 = arith.constant 0 : i32
    %c0_i32_1 = arith.constant 0 : i32
    return %c0_i32, %c0_i32_0 : i32, i32
  }
  func.func @transform_6(%arg0: i32) -> (i32, i32) {
    %c0_i32 = arith.constant 0 : i32
    %c0_i32_0 = arith.constant 0 : i32
    %c0_i32_1 = arith.constant 0 : i32
    return %c0_i32, %c0_i32_0 : i32, i32
  }
  func.func @transform_7(%arg0: i32) -> (i32, i32) {
    %c0_i32 = arith.constant 0 : i32
    %c0_i32_0 = arith.constant 0 : i32
    %c0_i32_1 = arith.constant 0 : i32
    return %c0_i32, %c0_i32_0 : i32, i32
  }
  func.func @transform_8(%arg0: i32) -> (i32, i32) {
    %c0_i32 = arith.constant 0 : i32
    %c0_i32_0 = arith.constant 0 : i32
    %c0_i32_1 = arith.constant 0 : i32
    return %c0_i32, %c0_i32_0 : i32, i32
  }
  func.func @transform_9(%arg0: i32) -> (i32, i32) {
    %c0_i32 = arith.constant 0 : i32
    %c0_i32_0 = arith.constant 0 : i32
    return %arg0, %c0_i32 : i32, i32
  }
  func.func @transform_10(%arg0: i32) -> (i32, i32) {
    %c0_i32 = arith.constant 0 : i32
    %c0_i32_0 = arith.constant 0 : i32
    return %arg0, %c0_i32 : i32, i32
  }
  func.func @transform_11(%arg0: i32) -> (i32, i32) {
    %c0_i32 = arith.constant 0 : i32
    %c0_i32_0 = arith.constant 0 : i32
    return %arg0, %c0_i32 : i32, i32
  }
  func.func @transform_12(%arg0: i32) -> (i32, i32) {
    %c0_i32 = arith.constant 0 : i32
    %c0_i32_0 = arith.constant 0 : i32
    return %arg0, %c0_i32 : i32, i32
  }
}

</mosaic_0001>

<bundles_post_ra>
// kernel: tpu_custom_call.1
= control target key start
LH: loop header
LB: loop body
LE: loop exit
PB: predicated region body
PF: predicated region fallthrough
CT: control target
= control target key end

     0   :  { %18 = vsyncpa [#allocation3], 0  ;;  %s1115_s0 = inlined_call_operand.hbm [shape: f32[16,32], index: 0, kind: input, shape index: {}]   ;;  %s1116_s1 = inlined_call_operand.hbm [shape: f32[16,32], index: 1, kind: input, shape index: {}]   ;;  %s1117_s2 = inlined_call_operand.hbm [shape: f32[16,32], index: 2, kind: input, shape index: {}]   ;;  %s1118_s3 = inlined_call_operand.hbm [shape: f32[16,32], index: 3, kind: input, shape index: {}]   ;;  %s1119_s4 = inlined_call_operand.hbm [shape: f32[32,32], index: 4, kind: input, shape index: {}]   ;;  %s1120_s5 = inlined_call_operand.hbm [shape: f32[32,32], index: 5, kind: input, shape index: {}]   ;;  %s1121_s6 = inlined_call_operand.hbm [shape: f32[32,32], index: 6, kind: input, shape index: {}]   ;;  %s1122_s7 = inlined_call_operand.hbm [shape: f32[32,32], index: 7, kind: input, shape index: {}]   ;;  %s1123_s8 = inlined_call_operand.vmem [shape: f32[1,32], index: 8, kind: input, shape index: {}]   ;;  %s1124_s9 = inlined_call_operand.hbm [shape: f32[16,32], index: 9, kind: output, shape index: {0}]   ;;  %s1125_s10 = inlined_call_operand.hbm [shape: f32[16,32], index: 10, kind: output, shape index: {1}]   ;;  %s1126_s11 = inlined_call_operand.hbm [shape: f32[16,32], index: 11, kind: output, shape index: {2}]   ;;  %s1127_s12 = inlined_call_operand.hbm [shape: f32[16,32], index: 12, kind: output, shape index: {3}]  }
   0x1   :  { %19 = vsyncpa [#allocation6], 0 }
   0x2   :  { %20 = vsyncpa [#allocation9], 0 }
   0x3   :  { %21 = vsyncpa [#allocation12], 0 }
   0x4   :  { %22 = vsyncpa [#allocation15], 0 }
   0x5   :  { %23 = vsyncpa [#allocation4], 0 }
   0x6   :  { %24 = vsyncpa [#allocation18], 0 }
   0x7   :  { %25 = vsyncpa [#allocation21], 0  ;;  %s790_s21 = smov [#allocation5]   ;;  %s791_s23 = smov [#allocation8]  }
   0x8   :  { %s43_s22 = sshll.u32 %s790_s21, 4  ;;  %s67_s24 = sshll.u32 %s791_s23, 4  ;;  %s44_s22 = int_to_ptr.vmem [resolvable:$true] %s43_s22  ;;  %s871_s24 = int_to_ptr.vmem [resolvable:$true] %s67_s24 }
   0x9   :  { %s510_s27 = scalar_lea.hbm %s1116_s1, 256 }
   0xa   :  { %p511_p0 = scmp.ne.s32.totalorder %s1116_s1, %s510_s27  ;;  %p514_p1 = scmp.lt.u32.totalorder %s510_s27, %s1116_s1 }
   0xc   :  { %p516_p2 = pnand %p514_p1, %p511_p0 }
   0xe   :  { %519 = shalt.err (!%p516_p2)
}
   0xf   :  { %s520_s14 = scalar_lea.vmem %s44_s22, 256  ;;  %p525_p4 = scmp.lt.s32.totalorder %s44_s22, %s44_s22 }
  0x10   :  { %p521_p3 = scmp.ne.s32.totalorder %s44_s22, %s520_s14  ;;  %p526_p5 = scmp.lt.s32.totalorder %s520_s14, %s520_s14 }
  0x12   :  { %p527_p6 = por %p526_p5, %p525_p4 }
  0x14   :  { %p528_p7 = pnand %p527_p6, %p521_p3 }
  0x16   :  { %531 = shalt.err (!%p528_p7)
}
  0x17   :  { %s792_s15 = smov 128   ;;  %s793_s16 = smov 8  }
  0x18   :  { %49 = dma.hbm_to_vmem [thread:$0]  %s1116_s1, 256, %s44_s22, [#allocation6], %s792_s15, %s792_s15, %s793_s16  }
  0x19   :  { %s532_s21 = scalar_lea.hbm %s1118_s3, 256 }
  0x1a   :  { %p533_p8 = scmp.ne.s32.totalorder %s1118_s3, %s532_s21  ;;  %p536_p9 = scmp.lt.u32.totalorder %s532_s21, %s1118_s3 }
  0x1c   :  { %p538_p10 = pnand %p536_p9, %p533_p8 }
  0x1e   :  { %541 = shalt.err (!%p538_p10)
}
  0x1f   :  { %s542_s28 = scalar_lea.vmem %s871_s24, 256  ;;  %p547_p12 = scmp.lt.s32.totalorder %s871_s24, %s871_s24 }
  0x20   :  { %p543_p11 = scmp.ne.s32.totalorder %s871_s24, %s542_s28  ;;  %p548_p13 = scmp.lt.s32.totalorder %s542_s28, %s542_s28 }
  0x22   :  { %p549_p0 = por %p548_p13, %p547_p12 }
  0x24   :  { %p550_p1 = pnand %p549_p0, %p543_p11 }
  0x26   :  { %553 = shalt.err (!%p550_p1)
}
  0x27   :  { %73 = dma.hbm_to_vmem [thread:$0]  %s1118_s3, 256, %s871_s24, [#allocation9], %s792_s15, %s792_s15, %s793_s16  }
  0x28   :  { %s794_s29 = smov [#allocation11]   ;;  %s795_s13 = smov [#allocation2]  }
  0x29   :  { %s91_s30 = sshll.u32 %s794_s29, 4  ;;  %s31_s14 = sshll.u32 %s795_s13, 4  ;;  %s92_s30 = int_to_ptr.vmem [resolvable:$true] %s91_s30  ;;  %s908_s14 = int_to_ptr.vmem [resolvable:$true] %s31_s14 }
  0x2a   :  { %s554_s19 = scalar_lea.hbm %s1120_s5, 512 }
  0x2b   :  { %p555_p2 = scmp.ne.s32.totalorder %s1120_s5, %s554_s19  ;;  %p558_p3 = scmp.lt.u32.totalorder %s554_s19, %s1120_s5 }
  0x2d   :  { %p560_p4 = pnand %p558_p3, %p555_p2 }
  0x2f   :  { %563 = shalt.err (!%p560_p4)
}
  0x30   :  { %s564_s3 = scalar_lea.vmem %s92_s30, 512  ;;  %p569_p6 = scmp.lt.s32.totalorder %s92_s30, %s92_s30 }
  0x31   :  { %p565_p5 = scmp.ne.s32.totalorder %s92_s30, %s564_s3  ;;  %p570_p7 = scmp.lt.s32.totalorder %s564_s3, %s564_s3 }
  0x33   :  { %p571_p8 = por %p570_p7, %p569_p6 }
  0x35   :  { %p572_p9 = pnand %p571_p8, %p565_p5 }
  0x37   :  { %575 = shalt.err (!%p572_p9)
}
  0x38   :  { %97 = dma.hbm_to_vmem [thread:$0]  %s1120_s5, 512, %s92_s30, [#allocation12], %s792_s15, %s792_s15, %s793_s16  }
  0x39   :  { %s576_s1 = scalar_lea.hbm %s1115_s0, 256 }
  0x3a   :  { %p577_p10 = scmp.ne.s32.totalorder %s1115_s0, %s576_s1  ;;  %p580_p11 = scmp.lt.u32.totalorder %s576_s1, %s1115_s0 }
  0x3c   :  { %p582_p12 = pnand %p580_p11, %p577_p10 }
  0x3e   :  { %585 = shalt.err (!%p582_p12)
}
  0x3f   :  { %s586_s18 = scalar_lea.vmem %s908_s14, 256  ;;  %p591_p0 = scmp.lt.s32.totalorder %s908_s14, %s908_s14 }
  0x40   :  { %p587_p13 = scmp.ne.s32.totalorder %s908_s14, %s586_s18  ;;  %p592_p1 = scmp.lt.s32.totalorder %s586_s18, %s586_s18 }
  0x42   :  { %p593_p2 = por %p592_p1, %p591_p0 }
  0x44   :  { %p594_p3 = pnand %p593_p2, %p587_p13 }
  0x46   :  { %597 = shalt.err (!%p594_p3)
}
  0x47   :  { %37 = dma.hbm_to_vmem [thread:$0]  %s1115_s0, 256, %s908_s14, [#allocation3], %s792_s15, %s792_s15, %s793_s16  }
  0x48   :  { %s796_s19 = smov [#allocation7]   ;;  %s797_s21 = smov [#allocation10]  }
  0x49   :  { %s55_s20 = sshll.u32 %s796_s19, 4  ;;  %s79_s23 = sshll.u32 %s797_s21, 4  ;;  %s56_s20 = int_to_ptr.vmem [resolvable:$true] %s55_s20  ;;  %s945_s23 = int_to_ptr.vmem [resolvable:$true] %s79_s23 }
  0x4a   :  { %s598_s24 = scalar_lea.hbm %s1117_s2, 256 }
  0x4b   :  { %p599_p4 = scmp.ne.s32.totalorder %s1117_s2, %s598_s24  ;;  %p602_p5 = scmp.lt.u32.totalorder %s598_s24, %s1117_s2 }
  0x4d   :  { %p604_p6 = pnand %p602_p5, %p599_p4 }
  0x4f   :  { %607 = shalt.err (!%p604_p6)
}
  0x50   :  { %s608_s0 = scalar_lea.vmem %s56_s20, 256  ;;  %p613_p8 = scmp.lt.s32.totalorder %s56_s20, %s56_s20 }
  0x51   :  { %p609_p7 = scmp.ne.s32.totalorder %s56_s20, %s608_s0  ;;  %p614_p9 = scmp.lt.s32.totalorder %s608_s0, %s608_s0 }
  0x53   :  { %p615_p10 = por %p614_p9, %p613_p8 }
  0x55   :  { %p616_p11 = pnand %p615_p10, %p609_p7 }
  0x57   :  { %619 = shalt.err (!%p616_p11)
}
  0x58   :  { %61 = dma.hbm_to_vmem [thread:$0]  %s1117_s2, 256, %s56_s20, [#allocation6], %s792_s15, %s792_s15, %s793_s16  }
  0x59   :  { %s620_s17 = scalar_lea.hbm %s1119_s4, 512 }
  0x5a   :  { %p621_p12 = scmp.ne.s32.totalorder %s1119_s4, %s620_s17  ;;  %p624_p13 = scmp.lt.u32.totalorder %s620_s17, %s1119_s4 }
  0x5c   :  { %p626_p0 = pnand %p624_p13, %p621_p12 }
  0x5e   :  { %629 = shalt.err (!%p626_p0)
}
  0x5f   :  { %s630_s21 = scalar_lea.vmem %s945_s23, 512  ;;  %p635_p2 = scmp.lt.s32.totalorder %s945_s23, %s945_s23 }
  0x60   :  { %p631_p1 = scmp.ne.s32.totalorder %s945_s23, %s630_s21  ;;  %p636_p3 = scmp.lt.s32.totalorder %s630_s21, %s630_s21 }
  0x62   :  { %p637_p4 = por %p636_p3, %p635_p2 }
  0x64   :  { %p638_p5 = pnand %p637_p4, %p631_p1 }
  0x66   :  { %641 = shalt.err (!%p638_p5)
}
  0x67   :  { %85 = dma.hbm_to_vmem [thread:$0]  %s1119_s4, 512, %s945_s23, [#allocation9], %s792_s15, %s792_s15, %s793_s16  }
  0x68   :  { %s798_s25 = smov [#allocation13]   ;;  %s799_s24 = smov [#allocation14]  }
  0x69   :  { %s103_s3 = sshll.u32 %s798_s25, 4  ;;  %s115_s26 = sshll.u32 %s799_s24, 4  ;;  %s104_s3 = int_to_ptr.vmem [resolvable:$true] %s103_s3  ;;  %s982_s26 = int_to_ptr.vmem [resolvable:$true] %s115_s26 }
  0x6a   :  { %s642_s1 = scalar_lea.hbm %s1121_s6, 512 }
  0x6b   :  { %p643_p6 = scmp.ne.s32.totalorder %s1121_s6, %s642_s1  ;;  %p646_p7 = scmp.lt.u32.totalorder %s642_s1, %s1121_s6 }
  0x6d   :  { %p648_p8 = pnand %p646_p7, %p643_p6 }
  0x6f   :  { %651 = shalt.err (!%p648_p8)
}
  0x70   :  { %s652_s4 = scalar_lea.vmem %s104_s3, 512  ;;  %p657_p10 = scmp.lt.s32.totalorder %s104_s3, %s104_s3 }
  0x71   :  { %p653_p9 = scmp.ne.s32.totalorder %s104_s3, %s652_s4  ;;  %p658_p11 = scmp.lt.s32.totalorder %s652_s4, %s652_s4 }
  0x73   :  { %p659_p12 = por %p658_p11, %p657_p10 }
  0x75   :  { %p660_p13 = pnand %p659_p12, %p653_p9 }
  0x77   :  { %663 = shalt.err (!%p660_p13)
}
  0x78   :  { %109 = dma.hbm_to_vmem [thread:$0]  %s1121_s6, 512, %s104_s3, [#allocation12], %s792_s15, %s792_s15, %s793_s16  }
  0x79   :  { %s664_s5 = scalar_lea.hbm %s1122_s7, 512 }
  0x7a   :  { %p665_p0 = scmp.ne.s32.totalorder %s1122_s7, %s664_s5  ;;  %p668_p1 = scmp.lt.u32.totalorder %s664_s5, %s1122_s7 }
  0x7c   :  { %p670_p2 = pnand %p668_p1, %p665_p0 }
  0x7e   :  { %673 = shalt.err (!%p670_p2)
}
  0x7f   :  { %s674_s20 = scalar_lea.vmem %s982_s26, 512  ;;  %p679_p4 = scmp.lt.s32.totalorder %s982_s26, %s982_s26 }
  0x80   :  { %p675_p3 = scmp.ne.s32.totalorder %s982_s26, %s674_s20  ;;  %p680_p5 = scmp.lt.s32.totalorder %s674_s20, %s674_s20 }
  0x82   :  { %p681_p6 = por %p680_p5, %p679_p4 }
  0x84   :  { %p682_p7 = pnand %p681_p6, %p675_p3 }
  0x86   :  { %685 = shalt.err (!%p682_p7)
}
  0x87   :  { %121 = dma.hbm_to_vmem [thread:$0]  %s1122_s7, 512, %s982_s26, [#allocation15], %s792_s15, %s792_s15, %s793_s16  }
  0x88   :  { %774 = dma.done.wait [#allocation3], 256  }
  0x89   :  { %775 = vsyncadd [#allocation3], 4294967040 }
  0x8a   :  { %776 = dma.done.wait [#allocation6], 512  }
  0x8b   :  { %777 = vsyncadd [#allocation6], 4294966784 }
  0x8c   :  { %778 = dma.done.wait [#allocation9], 768  }
  0x8d   :  { %779 = vsyncadd [#allocation9], 4294966528 }
  0x8e   :  { %780 = dma.done.wait [#allocation12], 1024  }
  0x8f   :  { %781 = vsyncadd [#allocation12], 4294966272 }
  0x90   :  { %782 = dma.done.wait [#allocation15], 512  }
  0x91   :  { %783 = vsyncadd [#allocation15], 4294966784  ;;  %v800_v0 = vmov 0.0   ;;  %vm801_vm0 = vmmov 0   ;;  %v152_v1 = vld [vmem:[#allocation10] sm:$0xff]  ;;  %v153_v2 = vld [vmem:[#allocation10 + $0x8] sm:$0xff] }
  0x92   :  { %462 = vmatprep.subr.bf16.mxu0 %v800_v0  ;;  %470 = vmatprep.subr.bf16.mxu1 %v800_v0  ;;  %v215_v3 = vld [vmem:[#allocation11] sm:$0xff]  ;;  %v156_v4 = vpack.c.bf16 %v153_v2, %v152_v1  ;;  %v216_v5 = vld [vmem:[#allocation11 + $0x8] sm:$0xff]  ;;  %v154_v6 = vld [vmem:[#allocation10 + $0x10] sm:$0xff]  ;;  %vm165_vm1 = vcmask 261120   ;;  %s802_s24 = smov [#allocation17]   ;;  %s803_s27 = smov [#allocation16]  }
  0x93   :  { %466 = vmatprep.mubr.msk.bf16.mxu0 %vm801_vm0, %v800_v0  ;;  %474 = vmatprep.mubr.msk.bf16.mxu1 %vm801_vm0, %v800_v0  ;;  %v155_v7 = vld [vmem:[#allocation10 + $0x18] sm:$0xff]  ;;  %v219_v8 = vpack.c.bf16 %v216_v5, %v215_v3  ;;  %v217_v9 = vld [vmem:[#allocation11 + $0x10] sm:$0xff]  ;;  %v149_v12 = vld [vmem:[#allocation2] sm:$0xff]  ;;  %s394_s26 = sshll.u32 %s802_s24, 4  ;;  %s382_s28 = sshll.u32 %s803_s27, 4  ;;  %s395_s26 = int_to_ptr.vmem [resolvable:$true] %s394_s26  ;;  %s1032_s28 = int_to_ptr.vmem [resolvable:$true] %s382_s28 }
  0x94   :  { %v218_v10 = vld [vmem:[#allocation11 + $0x18] sm:$0xff]  ;;  %463 = vmatpush3.bf16.msra.mxu0 %v156_v4  ;;  %v157_v11 = vpack.c.bf16 %v155_v7, %v154_v6  ;;  %v150_v13 = vld [vmem:[#allocation2 + $0x8] sm:$0xff]  ;;  %v212_v14 = vld [vmem:[#allocation5] sm:$0xff]  ;;  %s686_s0 = scalar_lea.vmem %s395_s26, 256  ;;  %p691_p9 = scmp.lt.s32.totalorder %s395_s26, %s395_s26 }
  0x95   :  { %471 = vmatpush3.bf16.msra.mxu1 %v219_v8  ;;  %464 = vmatprep.subr.bf16.mxu0 %v800_v0  ;;  %v220_v15 = vpack.c.bf16 %v218_v10, %v217_v9  ;;  %v213_v16 = vld [vmem:[#allocation5 + $0x8] sm:$0xff]  ;;  %v270_v17 = vld [vmem:[#allocation13] sm:$0xff]  ;;  %v271_v18 = vld [vmem:[#allocation13 + $0x8] sm:$0xff]  ;;  %v151_v21 = vpack.c.bf16 %v150_v13, %v149_v12  ;;  %p687_p8 = scmp.ne.s32.totalorder %s395_s26, %s686_s0  ;;  %p692_p10 = scmp.lt.s32.totalorder %s686_s0, %s686_s0 }
  0x96   :  { %472 = vmatprep.subr.bf16.mxu1 %v800_v0  ;;  %v325_v19 = vld [vmem:[#allocation14] sm:$0xff]  ;;  %v326_v20 = vld [vmem:[#allocation14 + $0x8] sm:$0xff]  ;;  %v214_v22 = vpack.c.bf16 %v213_v16, %v212_v14  ;;  %v274_v23 = vpack.c.bf16 %v271_v18, %v270_v17  ;;  %v272_v25 = vld [vmem:[#allocation13 + $0x10] sm:$0xff] }
  0x97   :  { %v329_v24 = vpack.c.bf16 %v326_v20, %v325_v19  ;;  %v273_v26 = vld [vmem:[#allocation13 + $0x18] sm:$0xff]  ;;  %v327_v27 = vld [vmem:[#allocation14 + $0x10] sm:$0xff]  ;;  %v267_v30 = vld [vmem:[#allocation7] sm:$0xff]  ;;  %p693_p11 = por %p692_p10, %p691_p9 }
  0x98   :  { %465 = vmatpush3.bf16.msra.mxu0 %v157_v11  ;;  %v328_v28 = vld [vmem:[#allocation14 + $0x18] sm:$0xff]  ;;  %v275_v29 = vpack.c.bf16 %v273_v26, %v272_v25  ;;  %v268_v31 = vld [vmem:[#allocation7 + $0x8] sm:$0xff]  ;;  %v322_v33 = vld [vmem:[#allocation8] sm:$0xff] }
  0x99   :  { %473 = vmatpush3.bf16.msra.mxu1 %v220_v15  ;;  %478 = vmatprep.subr.bf16.mxu0 %v800_v0  ;;  %v330_v32 = vpack.c.bf16 %v328_v28, %v327_v27  ;;  %v323_v34 = vld [vmem:[#allocation8 + $0x8] sm:$0xff]  ;;  %v269_v35 = vpack.c.bf16 %v268_v31, %v267_v30  ;;  %v445_v37 = vld [vmem:[%s1123_s8] ss:$0 sm:$0xff]  ;;  %s804_s8 = smov [#allocation19]   ;;  %p694_p12 = pnand %p693_p11, %p687_p8 }
  0x9a   :  { %486 = vmatprep.subr.bf16.mxu1 %v800_v0  ;;  %v324_v36 = vpack.c.bf16 %v323_v34, %v322_v33  ;;  %s1035_s1 = sshll.u32 %s804_s8, 4  ;;  %s407_s1 = int_to_ptr.vmem [resolvable:$true] %s1035_s1 }
  0x9b   :  { %467 = vmatmul.mubr.msk.bf16.vlgmr.msra.gmra.mrb[0].mxu0 %vm165_vm1, %v151_v21 }
  0x9c   :  { %475 = vmatmul.mubr.msk.bf16.vlgmr.msra.gmra.mrb[0].mxu1 %vm165_vm1, %v214_v22  ;;  %479 = vmatpush3.bf16.msra.mxu0 %v274_v23 }
  0x9d   :  { %487 = vmatpush3.bf16.msra.mxu1 %v329_v24  ;;  %480 = vmatprep.subr.bf16.mxu0 %v800_v0 }
  0x9e   :  { %488 = vmatprep.subr.bf16.mxu1 %v800_v0  ;;  %482 = vmatprep.mubr.msk.bf16.mxu0 %vm801_vm0, %v800_v0 }
  0x9f   :  { %490 = vmatprep.mubr.msk.bf16.mxu1 %vm801_vm0, %v800_v0 }
  0xa0   :  { %481 = vmatpush3.bf16.msra.mxu0 %v275_v29 }
  0xa1   :  { %489 = vmatpush3.bf16.msra.mxu1 %v330_v32 }
  0xa3   :  { %483 = vmatmul.mubr.msk.bf16.vlgmr.msra.gmra.mrb[4].mxu0 %vm165_vm1, %v269_v35 }
  0xa4   :  { %491 = vmatmul.mubr.msk.bf16.vlgmr.msra.gmra.mrb[4].mxu1 %vm165_vm1, %v324_v36 }
 0x16e   :  { %v203_v38 = vpop.f32.mrb[0].mxu0 }
 0x16f   :  { %v204_v39 = vadd.f32 %v445_v37, %v203_v38  ;;  %v258_v40 = vpop.f32.mrb[0].mxu1  ;;  %v468_v41 = vpop.f32.mrb[1].mxu0 }
 0x170   :  { %265 = vst.msk [vmem:[#allocation17] sm:$0xff] %vm165_vm1, %v258_v40  ;;  %v476_v42 = vpop.f32.mrb[1].mxu1  ;;  %v206_v43 = vpop.f32.mrb[2].mxu0 }
 0x171   :  { %210 = vst.msk [vmem:[#allocation16] sm:$0xff] %vm165_vm1, %v204_v39  ;;  %v207_v44 = vadd.f32 %v445_v37, %v206_v43  ;;  %v261_v45 = vpop.f32.mrb[2].mxu1  ;;  %v469_v46 = vpop.f32.mrb[3].mxu0 }
 0x172   :  { %266 = vst.msk [vmem:[#allocation17 + $0x8] sm:$0xff] %vm165_vm1, %v261_v45  ;;  %v477_v47 = vpop.f32.mrb[3].mxu1 }
 0x173   :  { %211 = vst.msk [vmem:[#allocation16 + $0x8] sm:$0xff] %vm165_vm1, %v207_v44 }
 0x174   :  { %697 = shalt.err (!%p694_p12)
}
 0x175   :  { %s698_s29 = scalar_lea.hbm %s1125_s10, 256 }
 0x176   :  { %p699_p13 = scmp.ne.s32.totalorder %s1125_s10, %s698_s29  ;;  %p702_p0 = scmp.lt.u32.totalorder %s698_s29, %s1125_s10 }
 0x178   :  { %p704_p1 = pnand %p702_p0, %p699_p13 }
 0x17a   :  { %707 = shalt.err (!%p704_p1)
}
 0x17b   :  { %400 = dma.vmem_to_hbm [thread:$0]  %s395_s26, 256, %s1125_s10, [#allocation18], %s792_s15, %s792_s15, %s793_s16  }
 0x17c   :  { %s708_s30 = scalar_lea.vmem %s1032_s28, 256  ;;  %p713_p3 = scmp.lt.s32.totalorder %s1032_s28, %s1032_s28 }
 0x17d   :  { %p709_p2 = scmp.ne.s32.totalorder %s1032_s28, %s708_s30  ;;  %p714_p4 = scmp.lt.s32.totalorder %s708_s30, %s708_s30 }
 0x17f   :  { %p715_p5 = por %p714_p4, %p713_p3 }
 0x181   :  { %p716_p6 = pnand %p715_p5, %p709_p2 }
 0x183   :  { %719 = shalt.err (!%p716_p6)
}
 0x184   :  { %s720_s2 = scalar_lea.hbm %s1124_s9, 256 }
 0x185   :  { %p721_p7 = scmp.ne.s32.totalorder %s1124_s9, %s720_s2  ;;  %p724_p8 = scmp.lt.u32.totalorder %s720_s2, %s1124_s9 }
 0x187   :  { %p726_p9 = pnand %p724_p8, %p721_p7 }
 0x189   :  { %729 = shalt.err (!%p726_p9)
}
 0x18a   :  { %388 = dma.vmem_to_hbm [thread:$0]  %s1032_s28, 256, %s1124_s9, [#allocation4], %s792_s15, %s792_s15, %s793_s16   ;;  %v313_v48 = vpop.f32.mrb[4].mxu0  ;;  %v368_v49 = vpop.f32.mrb[4].mxu1 }
 0x18b   :  { %s805_s24 = smov [#allocation20]   ;;  %320 = vst.msk [vmem:[#allocation19] sm:$0xff] %vm165_vm1, %v313_v48  ;;  %v484_v50 = vpop.f32.mrb[5].mxu0  ;;  %375 = vst.msk [vmem:[#allocation20] sm:$0xff] %vm165_vm1, %v368_v49  ;;  %v492_v51 = vpop.f32.mrb[5].mxu1  ;;  %s730_s9 = scalar_lea.vmem %s407_s1, 256 }
 0x18c   :  { %s418_s26 = sshll.u32 %s805_s24, 4  ;;  %v316_v52 = vpop.f32.mrb[6].mxu0  ;;  %v371_v53 = vpop.f32.mrb[6].mxu1  ;;  %p731_p10 = scmp.ne.s32.totalorder %s407_s1, %s730_s9  ;;  %s1076_s26 = int_to_ptr.vmem [resolvable:$true] %s418_s26 }
 0x18d   :  { %321 = vst.msk [vmem:[#allocation19 + $0x8] sm:$0xff] %vm165_vm1, %v316_v52  ;;  %v485_v54 = vpop.f32.mrb[7].mxu0  ;;  %376 = vst.msk [vmem:[#allocation20 + $0x8] sm:$0xff] %vm165_vm1, %v371_v53  ;;  %v493_v55 = vpop.f32.mrb[7].mxu1  ;;  %p735_p11 = scmp.lt.s32.totalorder %s407_s1, %s407_s1  ;;  %p736_p12 = scmp.lt.s32.totalorder %s730_s9, %s730_s9 }
 0x18f   :  { %p737_p13 = por %p736_p12, %p735_p11 }
 0x191   :  { %p738_p0 = pnand %p737_p13, %p731_p10 }
 0x193   :  { %741 = shalt.err (!%p738_p0)
}
 0x194   :  { %s742_s8 = scalar_lea.hbm %s1126_s11, 256 }
 0x195   :  { %p743_p1 = scmp.ne.s32.totalorder %s1126_s11, %s742_s8  ;;  %p746_p2 = scmp.lt.u32.totalorder %s742_s8, %s1126_s11 }
 0x197   :  { %p748_p3 = pnand %p746_p2, %p743_p1 }
 0x199   :  { %751 = shalt.err (!%p748_p3)
}
 0x19a   :  { %412 = dma.vmem_to_hbm [thread:$0]  %s407_s1, 256, %s1126_s11, [#allocation18], %s792_s15, %s792_s15, %s793_s16  }
 0x19b   :  { %s752_s13 = scalar_lea.vmem %s1076_s26, 256  ;;  %p757_p5 = scmp.lt.s32.totalorder %s1076_s26, %s1076_s26 }
 0x19c   :  { %p753_p4 = scmp.ne.s32.totalorder %s1076_s26, %s752_s13  ;;  %p758_p6 = scmp.lt.s32.totalorder %s752_s13, %s752_s13 }
 0x19e   :  { %p759_p7 = por %p758_p6, %p757_p5 }
 0x1a0   :  { %p760_p8 = pnand %p759_p7, %p753_p4 }
 0x1a2   :  { %763 = shalt.err (!%p760_p8)
}
 0x1a3   :  { %s764_s5 = scalar_lea.hbm %s1127_s12, 256 }
 0x1a4   :  { %p765_p9 = scmp.ne.s32.totalorder %s1127_s12, %s764_s5  ;;  %p768_p10 = scmp.lt.u32.totalorder %s764_s5, %s1127_s12 }
 0x1a6   :  { %p770_p11 = pnand %p768_p10, %p765_p9 }
 0x1a8   :  { %773 = shalt.err (!%p770_p11)
}
 0x1a9   :  { %424 = dma.vmem_to_hbm [thread:$0]  %s1076_s26, 256, %s1127_s12, [#allocation21], %s792_s15, %s792_s15, %s793_s16  }
 0x1aa   :  { %784 = dma.done.wait [#allocation4], 256  }
 0x1ab   :  { %785 = vsyncadd [#allocation4], 4294967040 }
 0x1ac   :  { %786 = dma.done.wait [#allocation18], 512  }
 0x1ad   :  { %787 = vsyncadd [#allocation18], 4294966784 }
 0x1ae   :  { %788 = dma.done.wait [#allocation21], 256  }
 0x1af   :  { %789 = vsyncadd [#allocation21], 4294967040 }
 0x1b0   :  { %437 = vsyncpa [#allocation3], 1 }
 0x1b1   :  { %438 = vsyncpa [#allocation6], 1 }
 0x1b2   :  { %439 = vsyncpa [#allocation9], 1 }
 0x1b3   :  { %440 = vsyncpa [#allocation12], 1 }
 0x1b4   :  { %441 = vsyncpa [#allocation15], 1 }
 0x1b5   :  { %442 = vsyncpa [#allocation4], 1 }
 0x1b6   :  { %443 = vsyncpa [#allocation18], 1 }
 0x1b7   :  { %444 = vsyncpa [#allocation21], 1 }

</bundles_post_ra>
